<compile_context>
chip_gen: v7x
topology: tpu7x:2x2x1
jax: 0.10.0
libtpu: 0.0.40
codegen_flags: <defaults>
</compile_context>

<pallas_src>
import functools

import jax
import jax.numpy as jnp
from jax.experimental import pallas as pl
from jax.experimental.pallas import tpu as pltpu


def _round_up(x, m):
    return (x + m - 1) // m * m


# ----------------------------------------------------------------------------
# Pallas kernel: (bn, K) @ (K, D) + bias(1, D)  -> (bn, D)
# ----------------------------------------------------------------------------
def _patch_embed_kernel(x_ref, w_ref, b_ref, o_ref):
    acc = jnp.dot(x_ref[...], w_ref[...], preferred_element_type=jnp.float32)
    o_ref[...] = (acc + b_ref[...]).astype(o_ref.dtype)


def _patch_embed_matmul(patches, w_mat, bias, *, bn=256, compute_dtype=None,
                        out_dtype=jnp.float32):
    n, k = patches.shape
    d = w_mat.shape[1]

    # Large row tile at real scale; clamp for tiny inputs so the grid stays sane.
    bn_eff = int(min(bn, _round_up(n, 8)))
    n_pad = _round_up(n, bn_eff)
    k_pad = _round_up(k, 128)   # lane-dense LHS / weight-sublane friendly
    d_pad = _round_up(d, 128)   # lane-dense (unmasked) output stores

    if compute_dtype is not None:
        patches = patches.astype(compute_dtype)
        w_mat = w_mat.astype(compute_dtype)

    patches_p = jnp.pad(patches, ((0, n_pad - n), (0, k_pad - k)))
    w_p = jnp.pad(w_mat, ((0, k_pad - k), (0, d_pad - d)))
    b_p = jnp.pad(bias.astype(jnp.float32).reshape(1, d), ((0, 0), (0, d_pad - d)))

    bytes_in = (patches_p.size * patches_p.dtype.itemsize
                + w_p.size * w_p.dtype.itemsize
                + b_p.size * b_p.dtype.itemsize)
    bytes_out = n_pad * d_pad * jnp.dtype(out_dtype).itemsize
    cost = pl.CostEstimate(flops=2 * n_pad * k_pad * d_pad,
                           transcendentals=0,
                           bytes_accessed=bytes_in + bytes_out)

    out = pl.pallas_call(
        _patch_embed_kernel,
        out_shape=jax.ShapeDtypeStruct((n_pad, d_pad), out_dtype),
        grid_spec=pltpu.PrefetchScalarGridSpec(
            num_scalar_prefetch=0,
            grid=(n_pad // bn_eff,),
            in_specs=[
                pl.BlockSpec((bn_eff, k_pad), lambda i: (i, 0)),   # streamed rows
                pl.BlockSpec((k_pad, d_pad), lambda i: (0, 0)),    # resident weight
                pl.BlockSpec((1, d_pad), lambda i: (0, 0)),        # resident bias
            ],
            out_specs=pl.BlockSpec((bn_eff, d_pad), lambda i: (i, 0)),
        ),
        compiler_params=pltpu.CompilerParams(
            dimension_semantics=("parallel",),
            vmem_limit_bytes=48 * 1024 * 1024,  # fits v5e/v6e/v7x (64 MiB physical on v7x)
        ),
        cost_estimate=cost,
    )(patches_p, w_p, b_p)
    return out[:n, :d]


# ----------------------------------------------------------------------------
# Forward pass: same semantics as PatchEmbed.forward (NCHW in, NCHW out)
# ----------------------------------------------------------------------------
def patch_embed_forward(x, proj_w, proj_b, *, patch_size, bn=256, compute_dtype=None):
    b, c, h, w = x.shape
    p = patch_size
    assert h % p == 0 and w % p == 0, "spatial dims must be divisible by patch_size"
    nh, nw = h // p, w // p
    d = proj_w.shape[0]

    # conv(kernel=stride=p) == patchify + matmul; patch feature order (c, kh, kw)
    # matches proj_w.reshape(d, c*p*p).
    patches = (
        x.reshape(b, c, nh, p, nw, p)
        .transpose(0, 2, 4, 1, 3, 5)
        .reshape(b * nh * nw, c * p * p)
    )
    w_mat = proj_w.reshape(d, c * p * p).T  # (K, D)

    tokens = _patch_embed_matmul(patches, w_mat, proj_b, bn=bn,
                                 compute_dtype=compute_dtype, out_dtype=x.dtype)
    # back to NCHW, matching nn.Conv2d output
    return tokens.reshape(b, nh, nw, d).transpose(0, 3, 1, 2)


# ----------------------------------------------------------------------------
# Pure-JAX reference (lax conv) for a correctness check
# ----------------------------------------------------------------------------
def reference_forward(x, proj_w, proj_b, *, patch_size):
    p = patch_size
    y = jax.lax.conv_general_dilated(
        x, proj_w, window_strides=(p, p), padding="VALID",
        dimension_numbers=("NCHW", "OIHW", "NCHW"),
        precision=jax.lax.Precision.HIGHEST,
    )
    return y + proj_b[None, :, None, None]


if __name__ == "__main__":
    # Small synthetic config consistent with the module.
    B, in_chans, img_size, patch_size, embed_dim = 2, 3, 32, 8, 96

    root = jax.random.PRNGKey(0)
    kx, kw, kb = jax.random.split(root, 3)
    x = jax.random.normal(kx, (B, in_chans, img_size, img_size), jnp.float32)
    fan_in = in_chans * patch_size * patch_size
    bound = 1.0 / (fan_in ** 0.5)
    proj_w = jax.random.uniform(
        kw, (embed_dim, in_chans, patch_size, patch_size), jnp.float32, -bound, bound)
    proj_b = jax.random.uniform(kb, (embed_dim,), jnp.float32, -bound, bound)

    # f32 path (exactness check against the conv reference).
    fwd = jax.jit(functools.partial(patch_embed_forward, patch_size=patch_size, bn=256))
    out = jax.block_until_ready(fwd(x, proj_w, proj_b))

    ref = reference_forward(x, proj_w, proj_b, patch_size=patch_size)
    assert out.shape == (B, embed_dim, img_size // patch_size, img_size // patch_size)
    assert bool(jnp.all(jnp.isfinite(out)))
    assert bool(jnp.allclose(out, ref, rtol=1e-2, atol=1e-2)), "f32 path mismatch vs reference"

    # bf16-matmul path (v6e/v7x optimization; f32 accumulation inside the kernel).
    fwd_bf16 = jax.jit(functools.partial(
        patch_embed_forward, patch_size=patch_size, bn=256, compute_dtype=jnp.bfloat16))
    out_bf16 = jax.block_until_ready(fwd_bf16(x, proj_w, proj_b))
    assert bool(jnp.allclose(out_bf16, ref, rtol=1e-1, atol=1e-1)), "bf16 path mismatch"

    print("KERNEL_OK")
</pallas_src>

<mosaic_0001>
module attributes {stable_mosaic.version = 11 : i64} {
  func.func @_patch_embed_kernel(%arg0: i32, %arg1: memref<32x256xf32, #tpu.memory_space<vmem>>, %arg2: memref<256x128xf32, #tpu.memory_space<vmem>>, %arg3: memref<1x128xf32, #tpu.memory_space<vmem>>, %arg4: memref<32x128xf32, #tpu.memory_space<vmem>>) attributes {dimension_semantics = [#tpu.dimension_semantics<parallel>], iteration_bounds = array<i64: 1>, scalar_prefetch = 0 : i64, scratch_operands = 0 : i64, tpu.core_type = #tpu.core_type<tc>, window_params = [{transform_indices = @transform_0, window_bounds = array<i64: 32, 256>}, {pipeline_mode = #tpu.pipeline_mode<synchronous>, transform_indices = @transform_1, window_bounds = array<i64: 256, 128>}, {pipeline_mode = #tpu.pipeline_mode<synchronous>, transform_indices = @transform_2, window_bounds = array<i64: 1, 128>}, {transform_indices = @transform_3, window_bounds = array<i64: 32, 128>}]} {
    %c0 = arith.constant 0 : index
    %c0_0 = arith.constant 0 : index
    %0 = vector.load %arg1[%c0, %c0_0] : memref<32x256xf32, #tpu.memory_space<vmem>>, vector<32x256xf32>
    %c0_1 = arith.constant 0 : index
    %c0_2 = arith.constant 0 : index
    %1 = vector.load %arg2[%c0_1, %c0_2] : memref<256x128xf32, #tpu.memory_space<vmem>>, vector<256x128xf32>
    %cst = arith.constant dense<0.000000e+00> : vector<32x128xf32>
    %2 = tpu.matmul %0, %1, %cst {dimension_numbers = #tpu.dot_dimension_numbers<[1], [0], [0], [1], [0, 0, 1, 1], [], []>} : vector<32x256xf32>, vector<256x128xf32>, vector<32x128xf32> -> vector<32x128xf32>
    %c0_3 = arith.constant 0 : index
    %c0_4 = arith.constant 0 : index
    %3 = vector.load %arg3[%c0_3, %c0_4] : memref<1x128xf32, #tpu.memory_space<vmem>>, vector<1x128xf32>
    %4 = vector.broadcast %3 : vector<1x128xf32> to vector<32x128xf32>
    %5 = arith.addf %2, %4 : vector<32x128xf32>
    %c0_5 = arith.constant 0 : index
    %c0_6 = arith.constant 0 : index
    %6 = vector.load %arg4[%c0_5, %c0_6] : memref<32x128xf32, #tpu.memory_space<vmem>>, vector<32x128xf32>
    tpu.vector_store %arg4[%c0_5, %c0_6], %5 {strides = array<i32>} : memref<32x128xf32, #tpu.memory_space<vmem>>, vector<32x128xf32>,
    return
  }
  func.func @transform_0(%arg0: i32) -> (i32, i32) {
    %c0_i32 = arith.constant 0 : i32
    %c0_i32_0 = arith.constant 0 : i32
    return %arg0, %c0_i32 : i32, i32
  }
  func.func @transform_1(%arg0: i32) -> (i32, i32) {
    %c0_i32 = arith.constant 0 : i32
    %c0_i32_0 = arith.constant 0 : i32
    %c0_i32_1 = arith.constant 0 : i32
    return %c0_i32, %c0_i32_0 : i32, i32
  }
  func.func @transform_2(%arg0: i32) -> (i32, i32) {
    %c0_i32 = arith.constant 0 : i32
    %c0_i32_0 = arith.constant 0 : i32
    %c0_i32_1 = arith.constant 0 : i32
    return %c0_i32, %c0_i32_0 : i32, i32
  }
  func.func @transform_3(%arg0: i32) -> (i32, i32) {
    %c0_i32 = arith.constant 0 : i32
    %c0_i32_0 = arith.constant 0 : i32
    return %arg0, %c0_i32 : i32, i32
  }
}

</mosaic_0001>

<bundles_post_ra>
// kernel: patch_embed_forward.1
= control target key start
LH: loop header
LB: loop body
LE: loop exit
PB: predicated region body
PF: predicated region fallthrough
CT: control target
= control target key end

     0   :  { %s445_s0 = inlined_call_operand.vmem [shape: f32[32,256], index: 0, kind: input, shape index: {}]   ;;  %s446_s1 = inlined_call_operand.vmem [shape: f32[256,128], index: 1, kind: input, shape index: {}]   ;;  %s447_s2 = inlined_call_operand.vmem [shape: f32[1,128], index: 2, kind: input, shape index: {}]   ;;  %s448_s3 = inlined_call_operand.hbm [shape: f32[32,128], index: 3, kind: output, shape index: {}]  }
   0x1   :  { %v39_v0 = vld [vmem:[%s446_s1 + $0x80] sm:$0xff]  ;;  %v40_v1 = vld [vmem:[%s446_s1 + $0x88] sm:$0xff]  ;;  %v41_v5 = vld [vmem:[%s446_s1 + $0x90] sm:$0xff] }
   0x2   :  { %v23_v2 = vld [vmem:[%s446_s1] sm:$0xff]  ;;  %v212_v3 = vpack.c.bf16 %v40_v1, %v39_v0  ;;  %v24_v4 = vld [vmem:[%s446_s1 + $0x8] sm:$0xff]  ;;  %v42_v6 = vld [vmem:[%s446_s1 + $0x98] sm:$0xff] }
   0x3   :  { %v214_v7 = vpack.c.bf16 %v24_v4, %v23_v2  ;;  %v216_v8 = vpack.c.bf16 %v42_v6, %v41_v5  ;;  %v25_v9 = vld [vmem:[%s446_s1 + $0x10] sm:$0xff]  ;;  %v26_v10 = vld [vmem:[%s446_s1 + $0x18] sm:$0xff]  ;;  %v43_v11 = vld [vmem:[%s446_s1 + $0xa0] sm:$0xff] }
   0x4   :  { %213 = vmatprep.subr.bf16.mxu0 %v212_v3  ;;  %244 = vmatprep.subr.bf16.mxu1 %v212_v3  ;;  %v44_v12 = vld [vmem:[%s446_s1 + $0xa8] sm:$0xff]  ;;  %v218_v13 = vpack.c.bf16 %v26_v10, %v25_v9  ;;  %v27_v15 = vld [vmem:[%s446_s1 + $0x20] sm:$0xff]  ;;  %v45_v17 = vld [vmem:[%s446_s1 + $0xb0] sm:$0xff] }
   0x5   :  { %215 = vmatpush3.bf16.msra.mxu0 %v214_v7  ;;  %252 = vmatpush3.bf16.msra.mxu1 %v214_v7  ;;  %v220_v14 = vpack.c.bf16 %v44_v12, %v43_v11  ;;  %v28_v16 = vld [vmem:[%s446_s1 + $0x28] sm:$0xff]  ;;  %v46_v18 = vld [vmem:[%s446_s1 + $0xb8] sm:$0xff]  ;;  %v29_v21 = vld [vmem:[%s446_s1 + $0x30] sm:$0xff] }
   0x6   :  { %217 = vmatprep.subr.bf16.mxu0 %v216_v8  ;;  %245 = vmatprep.subr.bf16.mxu1 %v216_v8  ;;  %v222_v19 = vpack.c.bf16 %v28_v16, %v27_v15  ;;  %v224_v20 = vpack.c.bf16 %v46_v18, %v45_v17  ;;  %v30_v22 = vld [vmem:[%s446_s1 + $0x38] sm:$0xff]  ;;  %v47_v23 = vld [vmem:[%s446_s1 + $0xc0] sm:$0xff]  ;;  %v48_v24 = vld [vmem:[%s446_s1 + $0xc8] sm:$0xff] }
   0x7   :  { %v16_v25 = vld [vmem:[%s445_s0 + $0x8] sm:$0xff]  ;;  %v226_v27 = vpack.c.bf16 %v30_v22, %v29_v21  ;;  %v228_v28 = vpack.c.bf16 %v48_v24, %v47_v23  ;;  %v31_v29 = vld [vmem:[%s446_s1 + $0x40] sm:$0xff] }
   0x8   :  { %126 = vmatprep.mubr.f32.mxu0 %v16_v25  ;;  %v20_v26 = vld [vmem:[%s445_s0 + $0x28] sm:$0xff] }
   0x9   :  { %219 = vmatpush3.bf16.msra.mxu0 %v218_v13  ;;  %253 = vmatpush3.bf16.msra.mxu1 %v218_v13  ;;  %v32_v30 = vld [vmem:[%s446_s1 + $0x48] sm:$0xff] }
   0xa   :  { %221 = vmatprep.subr.bf16.mxu0 %v220_v14  ;;  %246 = vmatprep.subr.bf16.mxu1 %v220_v14 }
   0xd   :  { %223 = vmatpush3.bf16.msra.mxu0 %v222_v19  ;;  %254 = vmatpush3.bf16.msra.mxu1 %v222_v19 }
   0xe   :  { %225 = vmatprep.subr.bf16.mxu0 %v224_v20  ;;  %247 = vmatprep.subr.bf16.mxu1 %v224_v20 }
   0xf   :  { %8 = vsyncpa [#allocation3], 0  ;;  %v49_v31 = vld [vmem:[%s446_s1 + $0xd0] sm:$0xff]  ;;  %v50_v32 = vld [vmem:[%s446_s1 + $0xd8] sm:$0xff]  ;;  %136 = vmatprep.mubr.f32.mxu1 %v20_v26  ;;  %v230_v33 = vpack.c.bf16 %v32_v30, %v31_v29  ;;  %s287_s12 = smov [#allocation2]  }
  0x10   :  { %v232_v34 = vpack.c.bf16 %v50_v32, %v49_v31  ;;  %v33_v35 = vld [vmem:[%s446_s1 + $0x50] sm:$0xff]  ;;  %v34_v36 = vld [vmem:[%s446_s1 + $0x58] sm:$0xff]  ;;  %v51_v37 = vld [vmem:[%s446_s1 + $0xe0] sm:$0xff]  ;;  %s156_s13 = sshll.u32 %s287_s12, 4  ;;  %s157_s13 = int_to_ptr.vmem [resolvable:$true] %s156_s13 }
  0x11   :  { %227 = vmatpush3.bf16.msra.mxu0 %v226_v27  ;;  %255 = vmatpush3.bf16.msra.mxu1 %v226_v27  ;;  %v52_v38 = vld [vmem:[%s446_s1 + $0xe8] sm:$0xff]  ;;  %v234_v39 = vpack.c.bf16 %v34_v36, %v33_v35  ;;  %v35_v41 = vld [vmem:[%s446_s1 + $0x60] sm:$0xff]  ;;  %v53_v43 = vld [vmem:[%s446_s1 + $0xf0] sm:$0xff]  ;;  %p268_p1 = scmp.lt.s32.totalorder %s157_s13, %s157_s13 }
  0x12   :  { %229 = vmatprep.subr.bf16.mxu0 %v228_v28  ;;  %248 = vmatprep.subr.bf16.mxu1 %v228_v28  ;;  %v236_v40 = vpack.c.bf16 %v52_v38, %v51_v37  ;;  %v36_v42 = vld [vmem:[%s446_s1 + $0x68] sm:$0xff]  ;;  %v54_v44 = vld [vmem:[%s446_s1 + $0xf8] sm:$0xff]  ;;  %v37_v47 = vld [vmem:[%s446_s1 + $0x70] sm:$0xff] }
  0x13   :  { %v238_v45 = vpack.c.bf16 %v36_v42, %v35_v41  ;;  %v240_v46 = vpack.c.bf16 %v54_v44, %v53_v43  ;;  %v38_v48 = vld [vmem:[%s446_s1 + $0x78] sm:$0xff]  ;;  %v15_v50 = vld [vmem:[%s445_s0] sm:$0xff]  ;;  %v17_v54 = vld [vmem:[%s445_s0 + $0x10] sm:$0xff] }
  0x14   :  { %v242_v49 = vpack.c.bf16 %v38_v48, %v37_v47  ;;  %v19_v51 = vld [vmem:[%s445_s0 + $0x20] sm:$0xff]  ;;  %v18_v52 = vld [vmem:[%s445_s0 + $0x18] sm:$0xff]  ;;  %v21_v55 = vld [vmem:[%s445_s0 + $0x30] sm:$0xff] }
  0x15   :  { %231 = vmatpush3.bf16.msra.mxu0 %v230_v33  ;;  %256 = vmatpush3.bf16.msra.mxu1 %v230_v33  ;;  %v22_v53 = vld [vmem:[%s445_s0 + $0x38] sm:$0xff]  ;;  %v167_v58 = vld [vmem:[%s447_s2] ss:$0 sm:$0xff]  ;;  %s263_s0 = scalar_lea.vmem %s157_s13, 512 }
  0x16   :  { %233 = vmatprep.subr.bf16.mxu0 %v232_v34  ;;  %249 = vmatprep.subr.bf16.mxu1 %v232_v34  ;;  %p264_p0 = scmp.ne.s32.totalorder %s157_s13, %s263_s0  ;;  %p269_p2 = scmp.lt.s32.totalorder %s263_s0, %s263_s0 }
  0x18   :  { %p270_p3 = por %p269_p2, %p268_p1 }
  0x19   :  { %235 = vmatpush3.bf16.msra.mxu0 %v234_v39  ;;  %257 = vmatpush3.bf16.msra.mxu1 %v234_v39 }
  0x1a   :  { %237 = vmatprep.subr.bf16.mxu0 %v236_v40  ;;  %250 = vmatprep.subr.bf16.mxu1 %v236_v40  ;;  %p271_p4 = pnand %p270_p3, %p264_p0 }
  0x1d   :  { %239 = vmatpush3.bf16.msra.mxu0 %v238_v45  ;;  %258 = vmatpush3.bf16.msra.mxu1 %v238_v45 }
  0x1e   :  { %241 = vmatprep.subr.bf16.mxu0 %v240_v46  ;;  %251 = vmatprep.subr.bf16.mxu1 %v240_v46 }
  0x21   :  { %243 = vmatpush3.bf16.msra.mxu0 %v242_v49  ;;  %259 = vmatpush3.bf16.msra.mxu1 %v242_v49 }
  0x24   :  { %127 = vmatmul.mubr.f32.vlgmr.msra.gmra.mrb[0].mxu0 %v15_v50  ;;  %137 = vmatmul.mubr.f32.vlgmr.msra.gmra.mrb[0].mxu1 %v19_v51 }
  0x25   :  { %131 = vmatprep.mubr.f32.mxu0 %v18_v52  ;;  %141 = vmatprep.mubr.f32.mxu1 %v22_v53 }
  0x28   :  { %132 = vmatmul.mubr.f32.gmra.mrb[2].mxu0 %v17_v54  ;;  %142 = vmatmul.mubr.f32.gmra.mrb[2].mxu1 %v21_v55 }
  0xf7   :  { %v200_v56 = vpop.f32.mrb[0].mxu0  ;;  %v206_v57 = vpop.f32.mrb[0].mxu1 }
  0xf8   :  { %v201_v59 = vpop.f32.mrb[1].mxu0  ;;  %v207_v60 = vpop.f32.mrb[1].mxu1 }
  0xf9   :  { %v202_v61 = vadd.f32 %v201_v59, %v200_v56  ;;  %v208_v62 = vadd.f32 %v207_v60, %v206_v57 }
  0xfb   :  { %v129_v63 = vadd.f32 %v202_v61, %v167_v58  ;;  %v139_v0 = vadd.f32 %v208_v62, %v167_v58  ;;  %v203_v1 = vpop.f32.mrb[2].mxu0  ;;  %v209_v2 = vpop.f32.mrb[2].mxu1 }
  0xfc   :  { %v204_v3 = vpop.f32.mrb[3].mxu0  ;;  %v210_v4 = vpop.f32.mrb[3].mxu1 }
  0xfd   :  { %147 = vst [vmem:[#allocation2] sm:$0xff] %v129_v63  ;;  %149 = vst [vmem:[#allocation2 + $0x10] sm:$0xff] %v139_v0  ;;  %v205_v5 = vadd.f32 %v204_v3, %v203_v1  ;;  %v211_v6 = vadd.f32 %v210_v4, %v209_v2 }
  0xff   :  { %v134_v7 = vadd.f32 %v205_v5, %v167_v58  ;;  %v144_v8 = vadd.f32 %v211_v6, %v167_v58 }
 0x101   :  { %148 = vst [vmem:[#allocation2 + $0x8] sm:$0xff] %v134_v7  ;;  %150 = vst [vmem:[#allocation2 + $0x18] sm:$0xff] %v144_v8 }
 0x102   :  { %274 = shalt.err (!%p271_p4)
}
 0x103   :  { %s275_s15 = scalar_lea.hbm %s448_s3, 512 }
 0x104   :  { %p276_p5 = scmp.ne.s32.totalorder %s448_s3, %s275_s15  ;;  %p279_p6 = scmp.lt.u32.totalorder %s275_s15, %s448_s3 }
 0x106   :  { %p281_p7 = pnand %p279_p6, %p276_p5 }
 0x108   :  { %284 = shalt.err (!%p281_p7)
}
 0x109   :  { %s288_s20 = smov 128   ;;  %s289_s21 = smov 8  }
 0x10a   :  { %162 = dma.vmem_to_hbm [thread:$0]  %s157_s13, 512, %s448_s3, [#allocation3], %s288_s20, %s288_s20, %s289_s21  }
 0x10b   :  { %285 = dma.done.wait [#allocation3], 512  }
 0x10c   :  { %286 = vsyncadd [#allocation3], 4294966784 }
 0x10d   :  { %166 = vsyncpa [#allocation3], 1 }

</bundles_post_ra>
